<compile_context>
chip_gen: v7x
topology: tpu7x:2x2x1
jax: 0.10.0
libtpu: 0.0.40
codegen_flags: <defaults>
</compile_context>

<pallas_src>
import math

import jax
import jax.numpy as jnp
from jax.experimental import pallas as pl
from jax.experimental.pallas import tpu as pltpu

BN_EPS = 1e-5


def _round_up(n, m):
    return ((n + m - 1) // m) * m


# --------------------------------------------------------------------------
# Fused Pallas kernel: (2, TN) lane-major input -> (5, TN) lane-major output.
# --------------------------------------------------------------------------

def _linker_kernel(x_ref, w1t_ref, b1_ref, w2t_ref, b2_ref, w3t_ref, b3_ref,
                   o_ref):
    x = x_ref[...]                                         # (2, TN)  batch on lanes
    w1t = w1t_ref[...]                                     # (32, 2)

    # Layer 1: K=2 contraction as two VPU broadcast MACs (outer products).
    h = (w1t[:, 0:1] * x[0:1, :]
         + w1t[:, 1:2] * x[1:2, :]
         + b1_ref[...])                                    # (32, TN)
    h = jnp.tanh(h)

    # Layer 2: MXU (32,32) @ (32,TN), lane-dense.
    h = jnp.dot(w2t_ref[...], h,
                preferred_element_type=jnp.float32) + b2_ref[...]
    h = jnp.tanh(h)

    # Layer 3: (5,32) @ (32,TN) -> lane-dense (5, TN) output block.
    o_ref[...] = (jnp.dot(w3t_ref[...], h,
                          preferred_element_type=jnp.float32) + b3_ref[...])


def linker_forward(x, params, *, max_lane_tile=8192):
    """x: (N, 2) f32 -> (N, 5) f32; Linker.forward with BN folded (eval mode)."""
    N, cin = x.shape
    H1 = params["w1t"].shape[0]
    H2 = params["w2t"].shape[0]
    Cout = params["w3t"].shape[0]

    # Batch lives on the lane axis; lane tiles are 128 wide.  For small N the
    # whole (padded) batch is one grid step; only very large N gets tiled.
    n_tile = min(_round_up(max(N, 1), 128), max_lane_tile)
    Np = _round_up(N, n_tile)
    grid = Np // n_tile

    xt = jnp.transpose(x)                                   # (2, N), batch on lanes
    if Np != N:
        xt = jnp.pad(xt, ((0, 0), (0, Np - N)))

    out_t = pl.pallas_call(
        _linker_kernel,
        grid=(grid,),
        in_specs=[
            pl.BlockSpec((cin, n_tile), lambda i: (0, i)),   # x^T tile
            pl.BlockSpec((H1, cin), lambda i: (0, 0)),       # W1^T (resident)
            pl.BlockSpec((H1, 1), lambda i: (0, 0)),         # b1
            pl.BlockSpec((H2, H1), lambda i: (0, 0)),        # W2^T
            pl.BlockSpec((H2, 1), lambda i: (0, 0)),         # b2
            pl.BlockSpec((Cout, H2), lambda i: (0, 0)),      # W3^T
            pl.BlockSpec((Cout, 1), lambda i: (0, 0)),       # b3
        ],
        out_specs=pl.BlockSpec((Cout, n_tile), lambda i: (0, i)),
        out_shape=jax.ShapeDtypeStruct((Cout, Np), jnp.float32),
        compiler_params=pltpu.CompilerParams(
            dimension_semantics=("parallel",)),
    )(
        xt,
        params["w1t"], params["b1"],
        params["w2t"], params["b2"],
        params["w3t"], params["b3"],
    )

    return jnp.transpose(out_t[:, :N])                       # (N, 5)


# --------------------------------------------------------------------------
# Parameters (deterministic), per-channel BN folding, pure-JAX reference.
# --------------------------------------------------------------------------

def make_raw_params(key):
    ks = jax.random.split(key, 6)

    def lin(kw, kb, fan_in, fan_out):
        w = jax.random.normal(kw, (fan_in, fan_out), jnp.float32) / math.sqrt(fan_in)
        b = jax.random.normal(kb, (fan_out,), jnp.float32) / math.sqrt(fan_in)
        return w, b

    w1, b1 = lin(ks[0], ks[1], 2, 32)
    w2, b2 = lin(ks[2], ks[3], 32, 32)
    w3, b3 = lin(ks[4], ks[5], 32, 5)
    return {"w1": w1, "b1": b1, "w2": w2, "b2": b2, "w3": w3, "b3": b3}


def fold_linear_bn(w, b, gamma, beta, mean, var, eps=BN_EPS):
    """Fold eval-mode BatchNorm1d into the preceding Linear (per-channel)."""
    s = gamma / jnp.sqrt(var + eps)
    return w * s[None, :], (b - mean) * s + beta


def make_kernel_params(raw, bn1, bn2):
    w1, b1 = fold_linear_bn(raw["w1"], raw["b1"], *bn1)
    w2, b2 = fold_linear_bn(raw["w2"], raw["b2"], *bn2)
    w3, b3 = raw["w3"], raw["b3"]
    # Transposed layout: batch on lanes inside the kernel.
    return {
        "w1t": w1.T, "b1": b1.reshape(-1, 1),
        "w2t": w2.T, "b2": b2.reshape(-1, 1),
        "w3t": w3.T, "b3": b3.reshape(-1, 1),
    }


def linker_reference(x, raw, bn1, bn2):
    """Pure-JAX reference with explicit Linear -> BN(eval) -> Tanh structure."""
    hp = jax.lax.Precision.HIGHEST

    def bn(h, gamma, beta, mean, var):
        return (h - mean) / jnp.sqrt(var + BN_EPS) * gamma + beta

    h = jnp.tanh(bn(jnp.dot(x, raw["w1"], precision=hp) + raw["b1"], *bn1))
    h = jnp.tanh(bn(jnp.dot(h, raw["w2"], precision=hp) + raw["b2"], *bn2))
    return jnp.dot(h, raw["w3"], precision=hp) + raw["b3"]


# --------------------------------------------------------------------------
# Main
# --------------------------------------------------------------------------

if __name__ == "__main__":
    key = jax.random.PRNGKey(0)
    kx, kp = jax.random.split(key)

    N = 256                                     # small batch of (N, 2) inputs
    x = jax.random.normal(kx, (N, 2), dtype=jnp.float32)

    raw = make_raw_params(kp)
    # BatchNorm1d state (gamma, beta, running_mean, running_var).  These are
    # the deterministic __init__ values; for a trained checkpoint substitute
    # the actual per-channel stats and the fold stays exact.
    bn1 = (jnp.ones(32, jnp.float32), jnp.zeros(32, jnp.float32),
           jnp.zeros(32, jnp.float32), jnp.ones(32, jnp.float32))
    bn2 = (jnp.ones(32, jnp.float32), jnp.zeros(32, jnp.float32),
           jnp.zeros(32, jnp.float32), jnp.ones(32, jnp.float32))
    params = make_kernel_params(raw, bn1, bn2)

    fwd = jax.jit(linker_forward)
    y = fwd(x, params)
    jax.block_until_ready(y)

    y_ref = linker_reference(x, raw, bn1, bn2)

    assert y.shape == (N, 5)
    assert bool(jnp.all(jnp.isfinite(y)))
    assert bool(jnp.allclose(y, y_ref, atol=1e-4, rtol=1e-4))
    print("KERNEL_OK")
</pallas_src>

<mosaic_0001>
module attributes {stable_mosaic.version = 11 : i64} {
  func.func @_linker_kernel(%arg0: i32, %arg1: memref<2x256xf32, #tpu.memory_space<vmem>>, %arg2: memref<32x2xf32, #tpu.memory_space<vmem>>, %arg3: memref<32x1xf32, #tpu.memory_space<vmem>>, %arg4: memref<32x32xf32, #tpu.memory_space<vmem>>, %arg5: memref<32x1xf32, #tpu.memory_space<vmem>>, %arg6: memref<5x32xf32, #tpu.memory_space<vmem>>, %arg7: memref<5x1xf32, #tpu.memory_space<vmem>>, %arg8: memref<5x256xf32, #tpu.memory_space<vmem>>) attributes {dimension_semantics = [#tpu.dimension_semantics<parallel>], iteration_bounds = array<i64: 1>, scalar_prefetch = 0 : i64, scratch_operands = 0 : i64, tpu.core_type = #tpu.core_type<tc>, window_params = [{transform_indices = @transform_0, window_bounds = array<i64: 2, 256>}, {pipeline_mode = #tpu.pipeline_mode<synchronous>, transform_indices = @transform_1, window_bounds = array<i64: 32, 2>}, {pipeline_mode = #tpu.pipeline_mode<synchronous>, transform_indices = @transform_2, window_bounds = array<i64: 32, 1>}, {pipeline_mode = #tpu.pipeline_mode<synchronous>, transform_indices = @transform_3, window_bounds = array<i64: 32, 32>}, {pipeline_mode = #tpu.pipeline_mode<synchronous>, transform_indices = @transform_4, window_bounds = array<i64: 32, 1>}, {pipeline_mode = #tpu.pipeline_mode<synchronous>, transform_indices = @transform_5, window_bounds = array<i64: 5, 32>}, {pipeline_mode = #tpu.pipeline_mode<synchronous>, transform_indices = @transform_6, window_bounds = array<i64: 5, 1>}, {transform_indices = @transform_7, window_bounds = array<i64: 5, 256>}]} {
    %c0 = arith.constant 0 : index
    %c0_0 = arith.constant 0 : index
    %0 = vector.load %arg1[%c0, %c0_0] : memref<2x256xf32, #tpu.memory_space<vmem>>, vector<2x256xf32>
    %c0_1 = arith.constant 0 : index
    %c0_2 = arith.constant 0 : index
    %1 = vector.load %arg2[%c0_1, %c0_2] : memref<32x2xf32, #tpu.memory_space<vmem>>, vector<32x2xf32>
    %2 = vector.extract_strided_slice %1 {offsets = [0, 0], sizes = [32, 1], strides = [1, 1]} : vector<32x2xf32> to vector<32x1xf32>
    %3 = vector.extract_strided_slice %0 {offsets = [0, 0], sizes = [1, 256], strides = [1, 1]} : vector<2x256xf32> to vector<1x256xf32>
    %4 = vector.broadcast %2 : vector<32x1xf32> to vector<32x256xf32>
    %5 = vector.broadcast %3 : vector<1x256xf32> to vector<32x256xf32>
    %6 = arith.mulf %4, %5 : vector<32x256xf32>
    %7 = vector.extract_strided_slice %1 {offsets = [0, 1], sizes = [32, 1], strides = [1, 1]} : vector<32x2xf32> to vector<32x1xf32>
    %8 = vector.extract_strided_slice %0 {offsets = [1, 0], sizes = [1, 256], strides = [1, 1]} : vector<2x256xf32> to vector<1x256xf32>
    %9 = vector.broadcast %7 : vector<32x1xf32> to vector<32x256xf32>
    %10 = vector.broadcast %8 : vector<1x256xf32> to vector<32x256xf32>
    %11 = arith.mulf %9, %10 : vector<32x256xf32>
    %12 = arith.addf %6, %11 : vector<32x256xf32>
    %c0_3 = arith.constant 0 : index
    %c0_4 = arith.constant 0 : index
    %13 = vector.load %arg3[%c0_3, %c0_4] : memref<32x1xf32, #tpu.memory_space<vmem>>, vector<32x1xf32>
    %14 = vector.broadcast %13 : vector<32x1xf32> to vector<32x256xf32>
    %15 = arith.addf %12, %14 : vector<32x256xf32>
    %16 = math.tanh %15 : vector<32x256xf32>
    %c0_5 = arith.constant 0 : index
    %c0_6 = arith.constant 0 : index
    %17 = vector.load %arg4[%c0_5, %c0_6] : memref<32x32xf32, #tpu.memory_space<vmem>>, vector<32x32xf32>
    %cst = arith.constant dense<0.000000e+00> : vector<32x256xf32>
    %18 = tpu.matmul %17, %16, %cst {dimension_numbers = #tpu.dot_dimension_numbers<[1], [0], [0], [1], [0, 0, 1, 1], [], []>} : vector<32x32xf32>, vector<32x256xf32>, vector<32x256xf32> -> vector<32x256xf32>
    %c0_7 = arith.constant 0 : index
    %c0_8 = arith.constant 0 : index
    %19 = vector.load %arg5[%c0_7, %c0_8] : memref<32x1xf32, #tpu.memory_space<vmem>>, vector<32x1xf32>
    %20 = vector.broadcast %19 : vector<32x1xf32> to vector<32x256xf32>
    %21 = arith.addf %18, %20 : vector<32x256xf32>
    %22 = math.tanh %21 : vector<32x256xf32>
    %c0_9 = arith.constant 0 : index
    %c0_10 = arith.constant 0 : index
    %23 = vector.load %arg6[%c0_9, %c0_10] : memref<5x32xf32, #tpu.memory_space<vmem>>, vector<5x32xf32>
    %cst_11 = arith.constant dense<0.000000e+00> : vector<5x256xf32>
    %24 = tpu.matmul %23, %22, %cst_11 {dimension_numbers = #tpu.dot_dimension_numbers<[1], [0], [0], [1], [0, 0, 1, 1], [], []>} : vector<5x32xf32>, vector<32x256xf32>, vector<5x256xf32> -> vector<5x256xf32>
    %c0_12 = arith.constant 0 : index
    %c0_13 = arith.constant 0 : index
    %25 = vector.load %arg7[%c0_12, %c0_13] : memref<5x1xf32, #tpu.memory_space<vmem>>, vector<5x1xf32>
    %26 = vector.broadcast %25 : vector<5x1xf32> to vector<5x256xf32>
    %27 = arith.addf %24, %26 : vector<5x256xf32>
    %c0_14 = arith.constant 0 : index
    %c0_15 = arith.constant 0 : index
    %28 = vector.load %arg8[%c0_14, %c0_15] : memref<5x256xf32, #tpu.memory_space<vmem>>, vector<5x256xf32>
    tpu.vector_store %arg8[%c0_14, %c0_15], %27 {strides = array<i32>} : memref<5x256xf32, #tpu.memory_space<vmem>>, vector<5x256xf32>,
    return
  }
  func.func @transform_0(%arg0: i32) -> (i32, i32) {
    %c0_i32 = arith.constant 0 : i32
    %c0_i32_0 = arith.constant 0 : i32
    return %c0_i32, %arg0 : i32, i32
  }
  func.func @transform_1(%arg0: i32) -> (i32, i32) {
    %c0_i32 = arith.constant 0 : i32
    %c0_i32_0 = arith.constant 0 : i32
    %c0_i32_1 = arith.constant 0 : i32
    return %c0_i32, %c0_i32_0 : i32, i32
  }
  func.func @transform_2(%arg0: i32) -> (i32, i32) {
    %c0_i32 = arith.constant 0 : i32
    %c0_i32_0 = arith.constant 0 : i32
    %c0_i32_1 = arith.constant 0 : i32
    return %c0_i32, %c0_i32_0 : i32, i32
  }
  func.func @transform_3(%arg0: i32) -> (i32, i32) {
    %c0_i32 = arith.constant 0 : i32
    %c0_i32_0 = arith.constant 0 : i32
    %c0_i32_1 = arith.constant 0 : i32
    return %c0_i32, %c0_i32_0 : i32, i32
  }
  func.func @transform_4(%arg0: i32) -> (i32, i32) {
    %c0_i32 = arith.constant 0 : i32
    %c0_i32_0 = arith.constant 0 : i32
    %c0_i32_1 = arith.constant 0 : i32
    return %c0_i32, %c0_i32_0 : i32, i32
  }
  func.func @transform_5(%arg0: i32) -> (i32, i32) {
    %c0_i32 = arith.constant 0 : i32
    %c0_i32_0 = arith.constant 0 : i32
    %c0_i32_1 = arith.constant 0 : i32
    return %c0_i32, %c0_i32_0 : i32, i32
  }
  func.func @transform_6(%arg0: i32) -> (i32, i32) {
    %c0_i32 = arith.constant 0 : i32
    %c0_i32_0 = arith.constant 0 : i32
    %c0_i32_1 = arith.constant 0 : i32
    return %c0_i32, %c0_i32_0 : i32, i32
  }
  func.func @transform_7(%arg0: i32) -> (i32, i32) {
    %c0_i32 = arith.constant 0 : i32
    %c0_i32_0 = arith.constant 0 : i32
    return %c0_i32, %arg0 : i32, i32
  }
}

</mosaic_0001>

<bundles_post_ra>
// kernel: linker_forward.1
= control target key start
LH: loop header
LB: loop body
LE: loop exit
PB: predicated region body
PF: predicated region fallthrough
CT: control target
= control target key end

     0   :  { %v491_v2 = vmov 1   ;;  %s614_s0 = inlined_call_operand.vmem [shape: f32[2,256], index: 0, kind: input, shape index: {}]   ;;  %s615_s1 = inlined_call_operand.vmem [shape: f32[32,2], index: 1, kind: input, shape index: {}]   ;;  %s616_s2 = inlined_call_operand.vmem [shape: f32[32,1], index: 2, kind: input, shape index: {}]   ;;  %s617_s3 = inlined_call_operand.vmem [shape: f32[32,32], index: 3, kind: input, shape index: {}]   ;;  %s618_s4 = inlined_call_operand.vmem [shape: f32[32,1], index: 4, kind: input, shape index: {}]   ;;  %s619_s5 = inlined_call_operand.vmem [shape: f32[5,32], index: 5, kind: input, shape index: {}]   ;;  %s620_s6 = inlined_call_operand.vmem [shape: f32[5,1], index: 6, kind: input, shape index: {}]   ;;  %s621_s7 = inlined_call_operand.hbm [shape: f32[5,256], index: 7, kind: output, shape index: {}]  }
   0x1   :  { %v30_v0 = vld [vmem:[%s615_s1 + $0x10] sm:$0xff]  ;;  %v28_v1 = vld [vmem:[%s615_s1] sm:$0xff]  ;;  %431 = vset.pattern.permute.xlu0 %v491_v2  ;;  %429 = vset.pattern.permute.xlu1 %v491_v2  ;;  %v29_v3 = vld [vmem:[%s615_s1 + $0x8] sm:$0xff] }
   0x2   :  { %88 = vperm.xlu0 %431, %v30_v0   ;;  %80 = vperm.xlu1 %429, %v28_v1  }
   0x3   :  { %12 = vsyncpa [#allocation3], 0  ;;  %v492_v4 = vmov 0   ;;  %v31_v5 = vld [vmem:[%s615_s1 + $0x18] sm:$0xff]  ;;  %v130_v6 = vld [vmem:[%s616_s2 + $0x8] sm:$0xff]  ;;  %v493_v15 = vmov 0.0   ;;  %v53_v16 = vlaneseq }
   0x4   :  { %v129_v7 = vld [vmem:[%s616_s2] sm:$0xff]  ;;  %v131_v9 = vld [vmem:[%s616_s2 + $0x10] sm:$0xff]  ;;  %v132_v11 = vld [vmem:[%s616_s2 + $0x18] sm:$0xff]  ;;  %274 = vmatprep.mubr.f32.mxu0 %v493_v15  ;;  %381 = vmatprep.mubr.f32.mxu1 %v493_v15  ;;  %vm197_vm0 = vcmask 261120   ;;  %s494_s10 = smov [#allocation2]  }
   0x5   :  { %v173_v8 = vld [vmem:[%s618_s4] sm:$0xff]  ;;  %v175_v10 = vld [vmem:[%s618_s4 + $0x10] sm:$0xff]  ;;  %v174_v13 = vld [vmem:[%s618_s4 + $0x8] sm:$0xff]  ;;  %v54_v17 = vshrl.u32 %v53_v16, 7  ;;  %s396_s11 = sshll.u32 %s494_s10, 4  ;;  %s397_s11 = int_to_ptr.vmem [resolvable:$true] %s396_s11 }
   0x6   :  { %432 = vset.pattern.permute.xlu0 %v492_v4  ;;  %84 = vperm.xlu1 %429, %v29_v3   ;;  %v308_v12 = vld [vmem:[%s620_s6] sm:$0x1f]  ;;  %v176_v14 = vld [vmem:[%s618_s4 + $0x18] sm:$0xff]  ;;  %s467_s12 = scalar_lea.vmem %s397_s11, 256  ;;  %p472_p1 = scmp.lt.s32.totalorder %s397_s11, %s397_s11 }
   0x7   :  { %34 = vperm.xlu0 %432, %v28_v1   ;;  %v55_v20 = vsub.s32 0, %v54_v17  ;;  %v59_v21 = vsub.s32 2, %v54_v17  ;;  %v97_v22 = vsub.s32 1, %v54_v17  ;;  %v101_v23 = vsub.s32 3, %v54_v17  ;;  %v27_v24 = vld [vmem:[%s614_s0] sm:$0xf]  ;;  %p468_p0 = scmp.ne.s32.totalorder %s397_s11, %s467_s12  ;;  %p473_p2 = scmp.lt.s32.totalorder %s467_s12, %s467_s12 }
   0x9   :  { %v56_v27 = vrot.slane %v27_v24, %v55_v20  ;;  %v60_v28 = vrot.slane %v27_v24, %v59_v21  ;;  %v98_v29 = vrot.slane %v27_v24, %v97_v22  ;;  %v102_v30 = vrot.slane %v27_v24, %v101_v23  ;;  %v169_v24 = vld [vmem:[%s617_s3] sm:$0xff]  ;;  %p474_p3 = por %p473_p2, %p472_p1 }
   0xa   :  { %430 = vset.pattern.permute.xlu1 %v492_v4 }
   0xb   :  { %39 = vperm.xlu0 %432, %v29_v3   ;;  %49 = vperm.xlu1 %430, %v31_v5   ;;  %v66_v31 = vrot.slane %v56_v27, %v55_v20  ;;  %v70_v34 = vrot.slane %v60_v28, %v55_v20  ;;  %v108_v35 = vrot.slane %v98_v29, %v97_v22  ;;  %v172_v27 = vld [vmem:[%s617_s3 + $0x18] sm:$0xff]  ;;  %p475_p4 = pnand %p474_p3, %p468_p0 }
   0xc   :  { %v112_v36 = vrot.slane %v102_v30, %v97_v22 }
   0xf   :  { %44 = vperm.xlu0 %432, %v30_v0   ;;  %433 = vset.pattern.permute.xlu1 %v491_v2 }
  0x10   :  { %92 = vperm.xlu1 %433, %v31_v5  }
  0x13   :  { %140 = vperm.xlu0 %432, %v130_v6  }
  0x14   :  { %434 = vset.pattern.permute.xlu1 %v492_v4 }
  0x15   :  { %135 = vperm.xlu1 %434, %v129_v7  }
  0x17   :  { %179 = vperm.xlu0 %432, %v173_v8  }
  0x19   :  { %145 = vperm.xlu1 %434, %v131_v9  }
  0x1b   :  { %189 = vperm.xlu0 %432, %v175_v10  }
  0x1d   :  { %150 = vperm.xlu1 %434, %v132_v11  }
  0x1f   :  { %311 = vperm.xlu0 %432, %v308_v12  }
  0x21   :  { %184 = vperm.xlu1 %434, %v174_v13  }
  0x25   :  { %194 = vperm.xlu1 %434, %v176_v14  }
  0x81   :  { %v81_v18 = vpop.permute.xlu1 %80  ;;  %v89_v19 = vpop.permute.xlu0 %88 }
  0x82   :  { %v113_v45 = vmul.f32 %v108_v35, %v81_v18  ;;  %v114_v46 = vmul.f32 %v112_v36, %v81_v18  ;;  %v117_v57 = vmul.f32 %v108_v35, %v89_v19  ;;  %v118_v60 = vmul.f32 %v112_v36, %v89_v19 }
  0x85   :  { %v85_v25 = vpop.permute.xlu1 %84 }
  0x86   :  { %v35_v26 = vpop.permute.xlu0 %34  ;;  %v115_v41 = vmul.f32 %v108_v35, %v85_v25  ;;  %v116_v42 = vmul.f32 %v112_v36, %v85_v25  ;;  %v170_v25 = vld [vmem:[%s617_s3 + $0x8] sm:$0xff] }
  0x87   :  { %v71_v39 = vmul.f32 %v66_v31, %v35_v26  ;;  %v72_v43 = vmul.f32 %v70_v34, %v35_v26  ;;  %v171_v26 = vld [vmem:[%s617_s3 + $0x10] sm:$0xff] }
  0x89   :  { %v121_v50 = vadd.f32 %v113_v45, %v71_v39  ;;  %v122_v54 = vadd.f32 %v114_v46, %v72_v43 }
  0x8a   :  { %v40_v32 = vpop.permute.xlu0 %39  ;;  %v50_v33 = vpop.permute.xlu1 %49 }
  0x8b   :  { %v73_v37 = vmul.f32 %v66_v31, %v40_v32  ;;  %v74_v38 = vmul.f32 %v70_v34, %v40_v32  ;;  %v77_v2 = vmul.f32 %v66_v31, %v50_v33  ;;  %v78_v3 = vmul.f32 %v70_v34, %v50_v33 }
  0x8d   :  { %v123_v47 = vadd.f32 %v115_v41, %v73_v37  ;;  %v124_v48 = vadd.f32 %v116_v42, %v74_v38 }
  0x8e   :  { %v45_v40 = vpop.permute.xlu0 %44 }
  0x8f   :  { %v93_v44 = vpop.permute.xlu1 %92  ;;  %v75_v51 = vmul.f32 %v66_v31, %v45_v40  ;;  %v76_v55 = vmul.f32 %v70_v34, %v45_v40 }
  0x90   :  { %v119_v61 = vmul.f32 %v108_v35, %v93_v44  ;;  %v120_v62 = vmul.f32 %v112_v36, %v93_v44 }
  0x91   :  { %v125_v63 = vadd.f32 %v117_v57, %v75_v51  ;;  %v126_v1 = vadd.f32 %v118_v60, %v76_v55 }
  0x92   :  { %v141_v49 = vpop.permute.xlu0 %140  ;;  %v127_v6 = vadd.f32 %v119_v61, %v77_v2  ;;  %v128_v7 = vadd.f32 %v120_v62, %v78_v3 }
  0x93   :  { %v155_v52 = vadd.f32 %v141_v49, %v123_v47  ;;  %v156_v53 = vadd.f32 %v141_v49, %v124_v48 }
  0x94   :  { %v136_v56 = vpop.permute.xlu1 %135 }
  0x95   :  { %435 = vtanh.f32 %v155_v52  ;;  %v153_v58 = vadd.f32 %v136_v56, %v121_v50  ;;  %v154_v59 = vadd.f32 %v136_v56, %v122_v54 }
  0x96   :  { %437 = vtanh.f32 %v156_v53  ;;  %v180_v28 = vpop.permute.xlu0 %179 }
  0x97   :  { %439 = vtanh.f32 %v153_v58 }
  0x98   :  { %441 = vtanh.f32 %v154_v59  ;;  %v146_v0 = vpop.permute.xlu1 %145  ;;  %v307_v59 = vld [vmem:[%s619_s5] sm:$0x1f] }
  0x99   :  { %v157_v4 = vadd.f32 %v146_v0, %v125_v63  ;;  %v158_v5 = vadd.f32 %v146_v0, %v126_v1 }
  0x9b   :  { %443 = vtanh.f32 %v157_v4 }
  0x9c   :  { %v151_v8 = vpop.permute.xlu1 %150  ;;  %445 = vtanh.f32 %v158_v5 }
  0x9d   :  { %v159_v9 = vadd.f32 %v151_v8, %v127_v6  ;;  %v160_v10 = vadd.f32 %v151_v8, %v128_v7 }
  0x9f   :  { %v436_v11 = vpop.eup %435  ;;  %447 = vtanh.f32 %v159_v9 }
  0xa0   :  { %v438_v12 = vpop.eup %437  ;;  %449 = vtanh.f32 %v160_v10  ;;  %v185_v33 = vpop.permute.xlu1 %184 }
  0xa1   :  { %v440_v13 = vpop.eup %439 }
  0xa2   :  { %v442_v14 = vpop.eup %441  ;;  %v411_v16 = vpack.c.bf16 %v436_v11, %v440_v13 }
  0xa3   :  { %v409_v17 = vpack.c.bf16 %v438_v12, %v442_v14 }
  0xa4   :  { %v195_v42 = vpop.permute.xlu1 %194 }
  0xa5   :  { %410 = vmatprep.subr.bf16.mxu0 %v409_v17  ;;  %v444_v18 = vpop.eup %443 }
  0xa6   :  { %412 = vmatpush1.bf16.msra.mxu0 %v411_v16  ;;  %v446_v19 = vpop.eup %445 }
  0xa9   :  { %v448_v20 = vpop.eup %447 }
  0xaa   :  { %v450_v21 = vpop.eup %449  ;;  %v415_v22 = vpack.c.bf16 %v448_v20, %v444_v18 }
  0xab   :  { %v413_v23 = vpack.c.bf16 %v450_v21, %v446_v19 }
  0xad   :  { %414 = vmatprep.subr.bf16.mxu0 %v413_v23 }
  0xae   :  { %416 = vmatpush1.bf16.msra.mxu0 %v415_v22 }
  0xb1   :  { %404 = vmatmul.mubr.msk.f32.vlgmr.msra.gmra.mrb[0].mxu0 %vm197_vm0, %v169_v24 }
  0xb2   :  { %280 = vmatprep.mubr.f32.mxu0 %v493_v15 }
  0xb5   :  { %405 = vmatmul.mubr.msk.f32.gmra.mrb[2].mxu0 %vm197_vm0, %v170_v25 }
  0xb6   :  { %286 = vmatprep.mubr.f32.mxu0 %v493_v15 }
  0xb9   :  { %406 = vmatmul.mubr.msk.f32.gmra.mrb[4].mxu0 %vm197_vm0, %v171_v26 }
  0xba   :  { %292 = vmatprep.mubr.f32.mxu0 %v493_v15  ;;  %v190_v15 = vpop.permute.xlu0 %189 }
  0xbd   :  { %407 = vmatmul.mubr.msk.f32.gmra.mrb[6].mxu0 %vm197_vm0, %v172_v27 }
  0xbe   :  { %v312_v60 = vpop.permute.xlu0 %311 }
 0x184   :  { %v276_v29 = vpop.f32.mrb[0].mxu0 }
 0x185   :  { %v277_v30 = vadd.f32 %v276_v29, %v180_v28  ;;  %v278_v31 = vpop.f32.mrb[1].mxu0 }
 0x186   :  { %v279_v32 = vadd.f32 %v278_v31, %v180_v28 }
 0x187   :  { %451 = vtanh.f32 %v277_v30 }
 0x188   :  { %v282_v34 = vpop.f32.mrb[2].mxu0  ;;  %453 = vtanh.f32 %v279_v32 }
 0x189   :  { %v283_v35 = vadd.f32 %v282_v34, %v185_v33  ;;  %v284_v36 = vpop.f32.mrb[3].mxu0 }
 0x18a   :  { %v285_v37 = vadd.f32 %v284_v36, %v185_v33 }
 0x18b   :  { %455 = vtanh.f32 %v283_v35 }
 0x18c   :  { %457 = vtanh.f32 %v285_v37  ;;  %v288_v38 = vpop.f32.mrb[4].mxu0 }
 0x18d   :  { %v289_v39 = vadd.f32 %v288_v38, %v190_v15  ;;  %v290_v40 = vpop.f32.mrb[5].mxu0 }
 0x18e   :  { %v291_v41 = vadd.f32 %v290_v40, %v190_v15 }
 0x18f   :  { %459 = vtanh.f32 %v289_v39 }
 0x190   :  { %v294_v43 = vpop.f32.mrb[6].mxu0  ;;  %461 = vtanh.f32 %v291_v41 }
 0x191   :  { %v295_v44 = vadd.f32 %v294_v43, %v195_v42  ;;  %v296_v45 = vpop.f32.mrb[7].mxu0  ;;  %v452_v47 = vpop.eup %451 }
 0x192   :  { %v297_v46 = vadd.f32 %v296_v45, %v195_v42  ;;  %v454_v48 = vpop.eup %453 }
 0x193   :  { %463 = vtanh.f32 %v295_v44 }
 0x194   :  { %465 = vtanh.f32 %v297_v46 }
 0x195   :  { %v456_v49 = vpop.eup %455 }
 0x196   :  { %v458_v50 = vpop.eup %457  ;;  %v419_v51 = vpack.c.bf16 %v456_v49, %v452_v47 }
 0x197   :  { %v417_v52 = vpack.c.bf16 %v458_v50, %v454_v48 }
 0x199   :  { %418 = vmatprep.subr.bf16.mxu1 %v417_v52  ;;  %v460_v53 = vpop.eup %459 }
 0x19a   :  { %420 = vmatpush1.bf16.msra.mxu1 %v419_v51  ;;  %v462_v54 = vpop.eup %461 }
 0x19d   :  { %v464_v55 = vpop.eup %463 }
 0x19e   :  { %v466_v56 = vpop.eup %465  ;;  %v423_v57 = vpack.c.bf16 %v464_v55, %v460_v53 }
 0x19f   :  { %v421_v58 = vpack.c.bf16 %v466_v56, %v462_v54 }
 0x1a1   :  { %422 = vmatprep.subr.bf16.mxu1 %v421_v58 }
 0x1a2   :  { %424 = vmatpush1.bf16.msra.mxu1 %v423_v57 }
 0x1a5   :  { %408 = vmatmul.mubr.msk.f32.vlgmr.msra.gmra.mrb[0].mxu1 %vm197_vm0, %v307_v59 }
 0x278   :  { %v383_v61 = vpop.f32.mrb[0].mxu1 }
 0x279   :  { %v384_v62 = vadd.f32 %v383_v61, %v312_v60  ;;  %v385_v63 = vpop.f32.mrb[1].mxu1 }
 0x27a   :  { %v386_v0 = vadd.f32 %v385_v63, %v312_v60 }
 0x27b   :  { %388 = vst [vmem:[#allocation2] sm:$0x1f] %v384_v62 }
 0x27c   :  { %389 = vst [vmem:[#allocation2 + $0x8] sm:$0x1f] %v386_v0 }
 0x27d   :  { %478 = shalt.err (!%p475_p4)
}
 0x27e   :  { %s479_s14 = scalar_lea.hbm %s621_s7, 256 }
 0x27f   :  { %p480_p5 = scmp.ne.s32.totalorder %s621_s7, %s479_s14  ;;  %p483_p6 = scmp.lt.u32.totalorder %s479_s14, %s621_s7 }
 0x281   :  { %p485_p7 = pnand %p483_p6, %p480_p5 }
 0x283   :  { %488 = shalt.err (!%p485_p7)
}
 0x284   :  { %399 = dma.vmem_to_hbm [thread:$0]  %s397_s11, 256, %s621_s7, [#allocation3]  }
 0x285   :  { %489 = dma.done.wait [#allocation3], 256  }
 0x286   :  { %490 = vsyncadd [#allocation3], 4294967040 }
 0x287   :  { %403 = vsyncpa [#allocation3], 1 }

</bundles_post_ra>
